<compile_context>
chip_gen: v7x
topology: tpu7x:2x2x1
jax: 0.10.0
libtpu: 0.0.40
codegen_flags: <defaults>
</compile_context>

<pallas_src>
import jax
import jax.numpy as jnp
from jax.experimental import pallas as pl
from jax.experimental.pallas import tpu as pltpu


def _mhca_kernel(text_ref, image_ref, w_it_ref, w_ti_ref, out_ref):
    """One batch block:  out = [ image @ W_ti | text @ W_it ].

    W_ti = wv_image @ w_out  (image_dim, output_dim)
    W_it = wv_text  @ w_out  (text_dim,  output_dim)
    (softmax over a single key == 1, so attention output == V, and the output
    projection is pre-folded into the V weights in the wrapper)
    """
    out_ti = jnp.dot(image_ref[...], w_ti_ref[...],
                     preferred_element_type=jnp.float32)
    out_it = jnp.dot(text_ref[...], w_it_ref[...],
                     preferred_element_type=jnp.float32)
    # single lane-dense store of both results
    out_ref[...] = jnp.concatenate([out_ti, out_it], axis=-1)


def _pick_batch_block(B):
    """Multiple-of-8 batch tile; >=2 grid steps at large B for megacore."""
    if B % 8 != 0 or B <= 256:
        return B            # full-extent block is always layout-legal
    tb = 256
    while B % tb != 0:      # terminates at 8 since B % 8 == 0
        tb //= 2
    return max(tb, 8)


def multi_head_cross_attention(text, image, params, *, num_heads):
    """Pallas wrapper. params holds (in_dim, out_dim)-layout weight matrices."""
    B, text_dim = text.shape
    _, image_dim = image.shape
    hidden_dim = params["wq_t"].shape[1]
    output_dim = params["w_out"].shape[1]
    assert hidden_dim % num_heads == 0, "hidden_dim must divide num_heads"

    # Fold the shared output projection into the V weights (in real use this
    # would be precomputed once at parameter-setup time, not per call).
    w_ti = jnp.dot(params["wv_i"], params["w_out"])   # (image_dim, output_dim)
    w_it = jnp.dot(params["wv_t"], params["w_out"])   # (text_dim,  output_dim)

    TB = _pick_batch_block(B)
    grid = (pl.cdiv(B, TB),)

    full2d = lambda i: (0, 0)

    combined = pl.pallas_call(
        _mhca_kernel,
        out_shape=jax.ShapeDtypeStruct((B, 2 * output_dim), jnp.float32),
        grid_spec=pltpu.PrefetchScalarGridSpec(
            num_scalar_prefetch=0,
            grid=grid,
            in_specs=[
                pl.BlockSpec((TB, text_dim), lambda i: (i, 0)),
                pl.BlockSpec((TB, image_dim), lambda i: (i, 0)),
                pl.BlockSpec((text_dim, output_dim), full2d),
                pl.BlockSpec((image_dim, output_dim), full2d),
            ],
            out_specs=pl.BlockSpec((TB, 2 * output_dim), lambda i: (i, 0)),
        ),
        compiler_params=pltpu.CompilerParams(
            dimension_semantics=("parallel",),
            vmem_limit_bytes=64 * 1024 * 1024,
        ),
    )(text, image, w_it, w_ti)

    # split the lane-dense combined output back into the two module outputs
    return combined[:, :output_dim], combined[:, output_dim:]


def _reference(text, image, params, *, num_heads):
    """Pure-JAX mirror of the PyTorch forward (seq len = 1), incl. softmax."""
    B = text.shape[0]
    hidden = params["wq_t"].shape[1]
    hd = hidden // num_heads

    def heads(x):  # (B, hidden) -> (B, H, 1, hd)
        return x.reshape(B, 1, num_heads, hd).transpose(0, 2, 1, 3)

    q_t, k_t, v_t = (heads(text @ params[k]) for k in ("wq_t", "wk_t", "wv_t"))
    q_i, k_i, v_i = (heads(image @ params[k]) for k in ("wq_i", "wk_i", "wv_i"))

    s_ti = jnp.einsum("bhqd,bhkd->bhqk", q_t, k_i) / (hd ** 0.5)
    s_it = jnp.einsum("bhqd,bhkd->bhqk", q_i, k_t) / (hd ** 0.5)
    p_ti = jax.nn.softmax(s_ti, axis=-1)
    p_it = jax.nn.softmax(s_it, axis=-1)
    o_ti = jnp.einsum("bhqk,bhkd->bhqd", p_ti, v_i).transpose(0, 2, 1, 3).reshape(B, -1)
    o_it = jnp.einsum("bhqk,bhkd->bhqd", p_it, v_t).transpose(0, 2, 1, 3).reshape(B, -1)
    return o_ti @ params["w_out"], o_it @ params["w_out"]


if __name__ == "__main__":
    # small shapes consistent with the module
    B, text_dim, image_dim = 8, 32, 48
    num_heads, hidden_dim, output_dim = 4, 32, 16

    key = jax.random.PRNGKey(0)
    ks = jax.random.split(key, 9)

    def w(k, shape):
        return jax.random.normal(k, shape, dtype=jnp.float32) * 0.1

    # weights in (in_dim, out_dim) layout (transposed vs torch.nn.Linear)
    params = {
        "wq_t": w(ks[0], (text_dim, hidden_dim)),
        "wk_t": w(ks[1], (text_dim, hidden_dim)),
        "wv_t": w(ks[2], (text_dim, hidden_dim)),
        "wq_i": w(ks[3], (image_dim, hidden_dim)),
        "wk_i": w(ks[4], (image_dim, hidden_dim)),
        "wv_i": w(ks[5], (image_dim, hidden_dim)),
        "w_out": w(ks[6], (hidden_dim, output_dim)),
    }
    text_features = jax.random.normal(ks[7], (B, text_dim), dtype=jnp.float32)
    image_features = jax.random.normal(ks[8], (B, image_dim), dtype=jnp.float32)

    out_ti, out_it = multi_head_cross_attention(
        text_features, image_features, params, num_heads=num_heads)
    jax.block_until_ready((out_ti, out_it))

    ref_ti, ref_it = _reference(text_features, image_features, params,
                                num_heads=num_heads)
    assert out_ti.shape == (B, output_dim) and out_it.shape == (B, output_dim)
    assert jnp.allclose(out_ti, ref_ti, atol=1e-4, rtol=1e-4)
    assert jnp.allclose(out_it, ref_it, atol=1e-4, rtol=1e-4)

    print("KERNEL_OK")
</pallas_src>

<mosaic_0001>
module attributes {stable_mosaic.version = 11 : i64} {
  func.func @_mhca_kernel(%arg0: i32, %arg1: memref<8x32xf32, #tpu.memory_space<vmem>>, %arg2: memref<8x48xf32, #tpu.memory_space<vmem>>, %arg3: memref<32x16xf32, #tpu.memory_space<vmem>>, %arg4: memref<48x16xf32, #tpu.memory_space<vmem>>, %arg5: memref<8x32xf32, #tpu.memory_space<vmem>>) attributes {dimension_semantics = [#tpu.dimension_semantics<parallel>], iteration_bounds = array<i64: 1>, scalar_prefetch = 0 : i64, scratch_operands = 0 : i64, tpu.core_type = #tpu.core_type<tc>, window_params = [{transform_indices = @transform_0, window_bounds = array<i64: 8, 32>}, {transform_indices = @transform_1, window_bounds = array<i64: 8, 48>}, {pipeline_mode = #tpu.pipeline_mode<synchronous>, transform_indices = @transform_2, window_bounds = array<i64: 32, 16>}, {pipeline_mode = #tpu.pipeline_mode<synchronous>, transform_indices = @transform_3, window_bounds = array<i64: 48, 16>}, {transform_indices = @transform_4, window_bounds = array<i64: 8, 32>}]} {
    %c0 = arith.constant 0 : index
    %c0_0 = arith.constant 0 : index
    %0 = vector.load %arg2[%c0, %c0_0] : memref<8x48xf32, #tpu.memory_space<vmem>>, vector<8x48xf32>
    %c0_1 = arith.constant 0 : index
    %c0_2 = arith.constant 0 : index
    %1 = vector.load %arg4[%c0_1, %c0_2] : memref<48x16xf32, #tpu.memory_space<vmem>>, vector<48x16xf32>
    %cst = arith.constant dense<0.000000e+00> : vector<8x16xf32>
    %2 = tpu.matmul %0, %1, %cst {dimension_numbers = #tpu.dot_dimension_numbers<[1], [0], [0], [1], [0, 0, 1, 1], [], []>} : vector<8x48xf32>, vector<48x16xf32>, vector<8x16xf32> -> vector<8x16xf32>
    %c0_3 = arith.constant 0 : index
    %c0_4 = arith.constant 0 : index
    %3 = vector.load %arg1[%c0_3, %c0_4] : memref<8x32xf32, #tpu.memory_space<vmem>>, vector<8x32xf32>
    %c0_5 = arith.constant 0 : index
    %c0_6 = arith.constant 0 : index
    %4 = vector.load %arg3[%c0_5, %c0_6] : memref<32x16xf32, #tpu.memory_space<vmem>>, vector<32x16xf32>
    %cst_7 = arith.constant dense<0.000000e+00> : vector<8x16xf32>
    %5 = tpu.matmul %3, %4, %cst_7 {dimension_numbers = #tpu.dot_dimension_numbers<[1], [0], [0], [1], [0, 0, 1, 1], [], []>} : vector<8x32xf32>, vector<32x16xf32>, vector<8x16xf32> -> vector<8x16xf32>
    %6 = tpu.concatenate %2, %5 in 1 : vector<8x16xf32>, vector<8x16xf32> -> vector<8x32xf32>
    %c0_8 = arith.constant 0 : index
    %c0_9 = arith.constant 0 : index
    %7 = vector.load %arg5[%c0_8, %c0_9] : memref<8x32xf32, #tpu.memory_space<vmem>>, vector<8x32xf32>
    tpu.vector_store %arg5[%c0_8, %c0_9], %6 {strides = array<i32>} : memref<8x32xf32, #tpu.memory_space<vmem>>, vector<8x32xf32>,
    return
  }
  func.func @transform_0(%arg0: i32) -> (i32, i32) {
    %c0_i32 = arith.constant 0 : i32
    %c0_i32_0 = arith.constant 0 : i32
    return %arg0, %c0_i32 : i32, i32
  }
  func.func @transform_1(%arg0: i32) -> (i32, i32) {
    %c0_i32 = arith.constant 0 : i32
    %c0_i32_0 = arith.constant 0 : i32
    return %arg0, %c0_i32 : i32, i32
  }
  func.func @transform_2(%arg0: i32) -> (i32, i32) {
    %c0_i32 = arith.constant 0 : i32
    %c0_i32_0 = arith.constant 0 : i32
    %c0_i32_1 = arith.constant 0 : i32
    return %c0_i32, %c0_i32_0 : i32, i32
  }
  func.func @transform_3(%arg0: i32) -> (i32, i32) {
    %c0_i32 = arith.constant 0 : i32
    %c0_i32_0 = arith.constant 0 : i32
    %c0_i32_1 = arith.constant 0 : i32
    return %c0_i32, %c0_i32_0 : i32, i32
  }
  func.func @transform_4(%arg0: i32) -> (i32, i32) {
    %c0_i32 = arith.constant 0 : i32
    %c0_i32_0 = arith.constant 0 : i32
    return %arg0, %c0_i32 : i32, i32
  }
}

</mosaic_0001>

<bundles_post_ra>
// kernel: tpu_custom_call.1
= control target key start
LH: loop header
LB: loop body
LE: loop exit
PB: predicated region body
PF: predicated region fallthrough
CT: control target
= control target key end

     0   :  { %9 = vsyncpa [#allocation3], 0  ;;  %s535_s0 = inlined_call_operand.hbm [shape: f32[8,32], index: 0, kind: input, shape index: {}]   ;;  %s536_s1 = inlined_call_operand.hbm [shape: f32[8,48], index: 1, kind: input, shape index: {}]   ;;  %s537_s2 = inlined_call_operand.hbm [shape: f32[32,16], index: 2, kind: input, shape index: {}]   ;;  %s538_s3 = inlined_call_operand.hbm [shape: f32[48,16], index: 3, kind: input, shape index: {}]   ;;  %s539_s4 = inlined_call_operand.hbm [shape: f32[8,32], index: 4, kind: output, shape index: {}]  }
   0x1   :  { %10 = vsyncpa [#allocation6], 0 }
   0x2   :  { %11 = vsyncpa [#allocation9], 0 }
   0x3   :  { %12 = vsyncpa [#allocation4], 0  ;;  %s437_s15 = smov [#allocation5]   ;;  %s438_s17 = smov [#allocation2]  }
   0x4   :  { %s29_s16 = sshll.u32 %s437_s15, 4  ;;  %s19_s18 = sshll.u32 %s438_s17, 4  ;;  %s30_s16 = int_to_ptr.vmem [resolvable:$true] %s29_s16  ;;  %s20_s18 = int_to_ptr.vmem [resolvable:$true] %s19_s18 }
   0x5   :  { %s319_s21 = scalar_lea.hbm %s536_s1, 128 }
   0x6   :  { %p320_p0 = scmp.ne.s32.totalorder %s536_s1, %s319_s21  ;;  %p323_p1 = scmp.lt.u32.totalorder %s319_s21, %s536_s1 }
   0x8   :  { %p325_p2 = pnand %p323_p1, %p320_p0 }
   0xa   :  { %328 = shalt.err (!%p325_p2)
}
   0xb   :  { %s329_s26 = scalar_lea.vmem %s30_s16, 128  ;;  %p334_p4 = scmp.lt.s32.totalorder %s30_s16, %s30_s16 }
   0xc   :  { %p330_p3 = scmp.ne.s32.totalorder %s30_s16, %s329_s26  ;;  %p335_p5 = scmp.lt.s32.totalorder %s329_s26, %s329_s26 }
   0xe   :  { %p336_p6 = por %p335_p5, %p334_p4 }
  0x10   :  { %p337_p7 = pnand %p336_p6, %p330_p3 }
  0x12   :  { %340 = shalt.err (!%p337_p7)
}
  0x13   :  { %32 = dma.hbm_to_vmem [thread:$0]  %s536_s1, 128, %s30_s16, [#allocation6]  }
  0x14   :  { %s341_s5 = scalar_lea.hbm %s535_s0, 128 }
  0x15   :  { %p342_p8 = scmp.ne.s32.totalorder %s535_s0, %s341_s5  ;;  %p345_p9 = scmp.lt.u32.totalorder %s341_s5, %s535_s0 }
  0x17   :  { %p347_p10 = pnand %p345_p9, %p342_p8 }
  0x19   :  { %350 = shalt.err (!%p347_p10)
}
  0x1a   :  { %s351_s10 = scalar_lea.vmem %s20_s18, 128  ;;  %p356_p12 = scmp.lt.s32.totalorder %s20_s18, %s20_s18 }
  0x1b   :  { %p352_p11 = scmp.ne.s32.totalorder %s20_s18, %s351_s10  ;;  %p357_p13 = scmp.lt.s32.totalorder %s351_s10, %s351_s10 }
  0x1d   :  { %p358_p0 = por %p357_p13, %p356_p12 }
  0x1f   :  { %p359_p1 = pnand %p358_p0, %p352_p11 }
  0x21   :  { %362 = shalt.err (!%p359_p1)
}
  0x22   :  { %22 = dma.hbm_to_vmem [thread:$0]  %s535_s0, 128, %s20_s18, [#allocation3]  }
  0x23   :  { %s439_s12 = smov [#allocation7]   ;;  %s363_s16 = scalar_lea.hbm %s537_s2, 512 }
  0x24   :  { %s38_s13 = sshll.u32 %s439_s12, 4  ;;  %p364_p2 = scmp.ne.s32.totalorder %s537_s2, %s363_s16  ;;  %s39_s13 = int_to_ptr.vmem [resolvable:$true] %s38_s13 }
  0x25   :  { %p367_p3 = scmp.lt.u32.totalorder %s363_s16, %s537_s2 }
  0x27   :  { %p369_p4 = pnand %p367_p3, %p364_p2 }
  0x29   :  { %372 = shalt.err (!%p369_p4)
}
  0x2a   :  { %s373_s22 = scalar_lea.vmem %s39_s13, 512  ;;  %p378_p6 = scmp.lt.s32.totalorder %s39_s13, %s39_s13 }
  0x2b   :  { %p374_p5 = scmp.ne.s32.totalorder %s39_s13, %s373_s22  ;;  %p379_p7 = scmp.lt.s32.totalorder %s373_s22, %s373_s22 }
  0x2d   :  { %p380_p8 = por %p379_p7, %p378_p6 }
  0x2f   :  { %p381_p9 = pnand %p380_p8, %p374_p5 }
  0x31   :  { %384 = shalt.err (!%p381_p9)
}
  0x32   :  { %s440_s0 = smov 128   ;;  %s441_s18 = smov 8  }
  0x33   :  { %44 = dma.hbm_to_vmem [thread:$0]  %s537_s2, 512, %s39_s13, [#allocation6], %s440_s0, %s440_s0, %s441_s18  }
  0x34   :  { %s442_s25 = smov [#allocation8]   ;;  %s385_s29 = scalar_lea.hbm %s538_s3, 768 }
  0x35   :  { %s50_s26 = sshll.u32 %s442_s25, 4  ;;  %p386_p10 = scmp.ne.s32.totalorder %s538_s3, %s385_s29  ;;  %s51_s26 = int_to_ptr.vmem [resolvable:$true] %s50_s26 }
  0x36   :  { %p389_p11 = scmp.lt.u32.totalorder %s385_s29, %s538_s3 }
  0x38   :  { %p391_p12 = pnand %p389_p11, %p386_p10 }
  0x3a   :  { %394 = shalt.err (!%p391_p12)
}
  0x3b   :  { %s395_s8 = scalar_lea.vmem %s51_s26, 768  ;;  %p400_p0 = scmp.lt.s32.totalorder %s51_s26, %s51_s26 }
  0x3c   :  { %p396_p13 = scmp.ne.s32.totalorder %s51_s26, %s395_s8  ;;  %p401_p1 = scmp.lt.s32.totalorder %s395_s8, %s395_s8 }
  0x3e   :  { %p402_p2 = por %p401_p1, %p400_p0 }
  0x40   :  { %p403_p3 = pnand %p402_p2, %p396_p13 }
  0x42   :  { %406 = shalt.err (!%p403_p3)
}
  0x43   :  { %56 = dma.hbm_to_vmem [thread:$0]  %s538_s3, 768, %s51_s26, [#allocation9], %s440_s0, %s440_s0, %s441_s18  }
  0x44   :  { %429 = dma.done.wait [#allocation3], 128  }
  0x45   :  { %430 = vsyncadd [#allocation3], 4294967168 }
  0x46   :  { %431 = dma.done.wait [#allocation6], 640  }
  0x47   :  { %432 = vsyncadd [#allocation6], 4294966656 }
  0x48   :  { %433 = dma.done.wait [#allocation9], 768  }
  0x49   :  { %434 = vsyncadd [#allocation9], 4294966528  ;;  %v443_v0 = vmov 0.0|0.0   ;;  %vm444_vm0 = vmmov 0   ;;  %v445_v1 = vmov 0.0   ;;  %v151_v2 = vld [vmem:[#allocation7] sm:$0xff] }
  0x4a   :  { %302 = vmatprep.subr.bf16.mxu1 %v443_v0  ;;  %290 = vmatprep.mubr.msk.f32.mxu1 %vm444_vm0, %v445_v1  ;;  %v152_v3 = vld [vmem:[#allocation7 + $0x8] sm:$0xff]  ;;  %v153_v4 = vld [vmem:[#allocation7 + $0x10] sm:$0xff]  ;;  %v154_v6 = vld [vmem:[#allocation7 + $0x18] sm:$0xff]  ;;  %vm155_vm1 = vcmask 261120   ;;  %vm76_vm2 = vcmask 392192   ;;  %s446_s3 = smov 16  }
  0x4b   :  { %293 = vmatprep.subr.bf16.mxu0 %v443_v0  ;;  %279 = vmatprep.mubr.msk.f32.mxu0 %vm444_vm0, %v445_v1  ;;  %v303_v5 = vpack.c.bf16 %v152_v3, %v151_v2  ;;  %v70_v7 = vld [vmem:[#allocation8] sm:$0xff]  ;;  %v71_v8 = vld [vmem:[#allocation8 + $0x8] sm:$0xff]  ;;  %v72_v9 = vld [vmem:[#allocation8 + $0x10] sm:$0xff]  ;;  %v306_v11 = vpack.c.bf16 %v154_v6, %v153_v4  ;;  %s447_s10 = smov [#allocation10]   ;;  %vm233_vm3 = vcmask 130048  }
  0x4c   :  { %v73_v10 = vld [vmem:[#allocation8 + $0x18] sm:$0xff]  ;;  %v294_v12 = vpack.c.bf16 %v71_v8, %v70_v7  ;;  %v74_v14 = vld [vmem:[#allocation8 + $0x20] sm:$0xff]  ;;  %v75_v15 = vld [vmem:[#allocation8 + $0x28] sm:$0xff]  ;;  %s242_s1 = sshll.u32 %s447_s10, 4  ;;  %s243_s1 = int_to_ptr.vmem [resolvable:$true] %s242_s1 }
  0x4d   :  { %304 = vmatpush3.bf16.msra.mxu1 %v303_v5  ;;  %v297_v13 = vpack.c.bf16 %v73_v10, %v72_v9  ;;  %v150_v16 = vld [vmem:[#allocation2] sm:$0xff]  ;;  %v300_v17 = vpack.c.bf16 %v75_v15, %v74_v14  ;;  %v69_v18 = vld [vmem:[#allocation5] sm:$0xff]  ;;  %s407_s11 = scalar_lea.vmem %s243_s1, 128  ;;  %p412_p5 = scmp.lt.s32.totalorder %s243_s1, %s243_s1 }
  0x4e   :  { %305 = vmatprep.subr.bf16.mxu1 %v443_v0  ;;  %295 = vmatpush3.bf16.msra.mxu0 %v294_v12  ;;  %p408_p4 = scmp.ne.s32.totalorder %s243_s1, %s407_s11  ;;  %p413_p6 = scmp.lt.s32.totalorder %s407_s11, %s407_s11 }
  0x4f   :  { %296 = vmatprep.subr.bf16.mxu0 %v443_v0 }
  0x50   :  { %p414_p7 = por %p413_p6, %p412_p5 }
  0x51   :  { %307 = vmatpush3.bf16.msra.mxu1 %v306_v11 }
  0x52   :  { %298 = vmatpush3.bf16.msra.mxu0 %v297_v13  ;;  %p415_p8 = pnand %p414_p7, %p408_p4 }
  0x53   :  { %299 = vmatprep.subr.bf16.mxu0 %v443_v0 }
  0x54   :  { %291 = vmatmul.mubr.msk.f32.vlgmr.msra.gmra.mrb[0].mxu1 %vm155_vm1, %v150_v16 }
  0x56   :  { %301 = vmatpush3.bf16.msra.mxu0 %v300_v17 }
  0x59   :  { %280 = vmatmul.mubr.msk.f32.vlgmr.msra.gmra.mrb[0].mxu0 %vm76_vm2, %v69_v18 }
 0x127   :  { %v225_v19 = vpop.f32.mrb[0].mxu1 }
 0x128   :  { %v292_v20 = vpop.f32.mrb[1].mxu1  ;;  %230 = vrot.lane.b32.xlu0 %v225_v19, %s446_s3 }
 0x12c   :  { %v146_v21 = vpop.f32.mrb[0].mxu0 }
 0x12d   :  { %v281_v22 = vpop.f32.mrb[1].mxu0 }
 0x19a   :  { %v231_v23 = vpop.permute.xlu0 %230 }
 0x19b   :  { %v234_v24 = vsel %vm233_vm3, %v146_v21, %v231_v23 }
 0x19c   :  { %235 = vst.msk [vmem:[#allocation10] sm:$0xff] %vm155_vm1, %v234_v24 }
 0x19d   :  { %418 = shalt.err (!%p415_p8)
}
 0x19e   :  { %s419_s14 = scalar_lea.hbm %s539_s4, 128 }
 0x19f   :  { %p420_p9 = scmp.ne.s32.totalorder %s539_s4, %s419_s14  ;;  %p423_p10 = scmp.lt.u32.totalorder %s419_s14, %s539_s4 }
 0x1a1   :  { %p425_p11 = pnand %p423_p10, %p420_p9 }
 0x1a3   :  { %428 = shalt.err (!%p425_p11)
}
 0x1a4   :  { %245 = dma.vmem_to_hbm [thread:$0]  %s243_s1, 128, %s539_s4, [#allocation4]  }
 0x1a5   :  { %435 = dma.done.wait [#allocation4], 128  }
 0x1a6   :  { %436 = vsyncadd [#allocation4], 4294967168 }
 0x1a7   :  { %249 = vsyncpa [#allocation3], 1 }
 0x1a8   :  { %250 = vsyncpa [#allocation6], 1 }
 0x1a9   :  { %251 = vsyncpa [#allocation9], 1 }
 0x1aa   :  { %252 = vsyncpa [#allocation4], 1 }

</bundles_post_ra>
